<compile_context>
chip_gen: v7x
topology: tpu7x:2x2x1
jax: 0.10.0
libtpu: 0.0.40
codegen_flags: <defaults>
</compile_context>

<pallas_src>
import functools

import jax
import jax.numpy as jnp
from jax.experimental import pallas as pl
from jax.experimental.pallas import tpu as pltpu


def _round_up(x, m):
    return (x + m - 1) // m * m


def _readout_kernel(edge_batch_ref, edge_attr_ref, w1_ref, b1_ref, w2_ref, b2_ref,
                    out_ref, sums_ref, counts_ref, *, num_graphs_padded):
    step = pl.program_id(0)
    te = edge_attr_ref.shape[0]

    # ---- init accumulators on the first edge tile ----
    @pl.when(step == 0)
    def _():
        sums_ref[...] = jnp.zeros_like(sums_ref)
        counts_ref[...] = jnp.zeros_like(counts_ref)

    # ---- scatter-sum this edge tile into the per-graph accumulators ----
    eb = edge_batch_ref[...]                                          # (1, TE) int32
    gids = jax.lax.broadcasted_iota(jnp.int32, (num_graphs_padded, te), 0)
    hit = (gids == eb)                                                # (Gp, TE) bool
    # One-hot in edge_attr's dtype: exact for 0/1; bf16 edge_attr takes the fast
    # bf16 MXU path on v6e/v7x.
    onehot = hit.astype(edge_attr_ref.dtype)
    sums_ref[...] += jnp.dot(onehot, edge_attr_ref[...],
                             preferred_element_type=jnp.float32)      # (Gp, in_dim)
    counts_ref[...] += jnp.sum(hit.astype(jnp.float32), axis=-1, keepdims=True)

    # ---- finalize on the last edge tile: mean + MLP + lane-dense store ----
    @pl.when(step == pl.num_programs(0) - 1)
    def _():
        inv = pl.reciprocal(jnp.maximum(counts_ref[...], 1.0), approx=True)  # EUP vrcp
        graph_feat = sums_ref[...] * inv                              # (Gp, in_dim)
        h = jnp.dot(graph_feat, w1_ref[...],
                    preferred_element_type=jnp.float32) + b1_ref[...]
        h = jnp.maximum(h, 0.0)
        o = jnp.dot(h, w2_ref[...],
                    preferred_element_type=jnp.float32) + b2_ref[...]
        out_ref[...] = o.astype(out_ref.dtype)


def mlp_edge_readout(edge_index, edge_attr, batch, params, num_graphs, *, edge_tile=512):
    """edge_index: (2, E) int32, edge_attr: (E, in_dim), batch: (N,) int32.

    edge_tile: edges per grid step (multiple of 128). Default 512 suits v5e/v6e;
    use roughly half on v7x (64 MiB VMEM) for very large feature dims.
    """
    w1, b1, w2, b2 = params
    E, in_dim = edge_attr.shape
    hidden_dim = w1.shape[1]
    out_dim = w2.shape[1]

    # --- lane/sublane-dense padding (exact: zero pads, sliced off at the end) ---
    hid_p = _round_up(hidden_dim, 128)
    out_p = _round_up(out_dim, 128)
    g_pad = _round_up(num_graphs, 8)
    w1p = jnp.pad(w1, ((0, 0), (0, hid_p - hidden_dim)))
    b1p = jnp.pad(b1, ((0, 0), (0, hid_p - hidden_dim)))
    w2p = jnp.pad(w2, ((0, hid_p - hidden_dim), (0, out_p - out_dim)))
    b2p = jnp.pad(b2, ((0, 0), (0, out_p - out_dim)))

    # --- glue: per-edge graph id, then pad the edge axis to a multiple of the tile ---
    edge_batch = batch[edge_index[0]].astype(jnp.int32)
    te = min(int(edge_tile), _round_up(E, 128))
    e_pad = _round_up(E, te)
    n_tiles = e_pad // te
    # Pad id with -1 (matches nothing -> dropped, like segment_sum out-of-range).
    edge_batch = jnp.pad(edge_batch, (0, e_pad - E), constant_values=-1).reshape(1, e_pad)
    edge_attr_p = jnp.pad(edge_attr, ((0, e_pad - E), (0, 0)))

    kernel = functools.partial(_readout_kernel, num_graphs_padded=g_pad)

    resident = lambda shape: pl.BlockSpec(shape, lambda e: (0,) * len(shape))
    out_padded = pl.pallas_call(
        kernel,
        out_shape=jax.ShapeDtypeStruct((g_pad, out_p), jnp.float32),
        grid_spec=pltpu.PrefetchScalarGridSpec(
            num_scalar_prefetch=0,
            grid=(n_tiles,),
            in_specs=[
                pl.BlockSpec((1, te), lambda e: (0, e)),        # edge_batch tile
                pl.BlockSpec((te, in_dim), lambda e: (e, 0)),   # edge_attr tile
                resident((in_dim, hid_p)),                      # w1 (VMEM-resident)
                resident((1, hid_p)),                           # b1
                resident((hid_p, out_p)),                       # w2
                resident((1, out_p)),                           # b2
            ],
            out_specs=resident((g_pad, out_p)),                 # resident output
            scratch_shapes=[
                pltpu.VMEM((g_pad, in_dim), jnp.float32),       # running sums
                pltpu.VMEM((g_pad, 1), jnp.float32),            # running counts
            ],
        ),
        compiler_params=pltpu.CompilerParams(
            # Edge axis is a reduction into the scratch accumulators.
            dimension_semantics=("arbitrary",),
        ),
    )(edge_batch, edge_attr_p, w1p, b1p, w2p, b2p)

    return out_padded[:num_graphs, :out_dim]


def init_params(key, in_dim, hidden_dim, out_dim):
    """Deterministic init mirroring nn.Linear shapes (stored transposed: [in, out])."""
    k1, k2, k3, k4 = jax.random.split(key, 4)
    lim1 = 1.0 / jnp.sqrt(in_dim)
    lim2 = 1.0 / jnp.sqrt(hidden_dim)
    w1 = jax.random.uniform(k1, (in_dim, hidden_dim), jnp.float32, -lim1, lim1)
    b1 = jax.random.uniform(k2, (1, hidden_dim), jnp.float32, -lim1, lim1)
    w2 = jax.random.uniform(k3, (hidden_dim, out_dim), jnp.float32, -lim2, lim2)
    b2 = jax.random.uniform(k4, (1, out_dim), jnp.float32, -lim2, lim2)
    return w1, b1, w2, b2


if __name__ == "__main__":
    key = jax.random.PRNGKey(0)
    kp, ka, ki, kb = jax.random.split(key, 4)

    # Small-but-tiled graph batch: N nodes across G graphs, E edges.
    N, E, G = 64, 512, 4
    in_dim, hidden_dim, out_dim = 16, 32, 8

    params = init_params(kp, in_dim, hidden_dim, out_dim)

    edge_attr = jax.random.normal(ka, (E, in_dim), jnp.float32)
    edge_index = jax.random.randint(ki, (2, E), 0, N, jnp.int32)
    # Sorted node->graph assignment (as in PyG batching).
    batch = jnp.sort(jax.random.randint(kb, (N,), 0, G, jnp.int32))

    # edge_tile=128 -> 4 grid steps: exercises init / accumulate / finalize paths.
    out = mlp_edge_readout(edge_index, edge_attr, batch, params,
                           num_graphs=G, edge_tile=128)
    jax.block_until_ready(out)
    assert out.shape == (G, out_dim)

    # Pure-JAX reference check (exact division; kernel uses the EUP approx reciprocal
    # for the mean, hence the relaxed tolerance).
    eb = batch[edge_index[0]]
    sums = jax.ops.segment_sum(edge_attr, eb, num_segments=G)
    cnts = jax.ops.segment_sum(jnp.ones((E,), jnp.float32), eb, num_segments=G)
    gfeat = sums / jnp.maximum(cnts, 1.0)[:, None]
    w1, b1, w2, b2 = params
    ref = jnp.maximum(gfeat @ w1 + b1, 0.0) @ w2 + b2
    assert jnp.allclose(out, ref, atol=1e-2, rtol=1e-2), "mismatch vs reference"

    print("KERNEL_OK")
</pallas_src>

<mosaic_0001>
module attributes {stable_mosaic.version = 11 : i64} {
  func.func @_readout_kernel(%arg0: i32, %arg1: memref<1x128xi32, #tpu.memory_space<vmem>>, %arg2: memref<128x16xf32, #tpu.memory_space<vmem>>, %arg3: memref<16x128xf32, #tpu.memory_space<vmem>>, %arg4: memref<1x128xf32, #tpu.memory_space<vmem>>, %arg5: memref<128x128xf32, #tpu.memory_space<vmem>>, %arg6: memref<1x128xf32, #tpu.memory_space<vmem>>, %arg7: memref<8x128xf32, #tpu.memory_space<vmem>>, %arg8: memref<8x16xf32, #tpu.memory_space<vmem>>, %arg9: memref<8x1xf32, #tpu.memory_space<vmem>>) attributes {dimension_semantics = [#tpu.dimension_semantics<arbitrary>], iteration_bounds = array<i64: 4>, scalar_prefetch = 0 : i64, scratch_operands = 2 : i64, tpu.core_type = #tpu.core_type<tc>, window_params = [{transform_indices = @transform_0, window_bounds = array<i64: 1, 128>}, {transform_indices = @transform_1, window_bounds = array<i64: 128, 16>}, {pipeline_mode = #tpu.pipeline_mode<synchronous>, transform_indices = @transform_2, window_bounds = array<i64: 16, 128>}, {pipeline_mode = #tpu.pipeline_mode<synchronous>, transform_indices = @transform_3, window_bounds = array<i64: 1, 128>}, {pipeline_mode = #tpu.pipeline_mode<synchronous>, transform_indices = @transform_4, window_bounds = array<i64: 128, 128>}, {pipeline_mode = #tpu.pipeline_mode<synchronous>, transform_indices = @transform_5, window_bounds = array<i64: 1, 128>}, {pipeline_mode = #tpu.pipeline_mode<synchronous>, transform_indices = @transform_6, window_bounds = array<i64: 8, 128>}]} {
    %c0_i32 = arith.constant 0 : i32
    %0 = arith.cmpi eq, %arg0, %c0_i32 : i32
    %1 = arith.extui %0 : i1 to i32
    %c0_i32_0 = arith.constant 0 : i32
    %2 = arith.cmpi ne, %1, %c0_i32_0 : i32
    scf.if %2 {
      %cst_14 = arith.constant 0.000000e+00 : f32
      %24 = vector.broadcast %cst_14 : f32 to vector<8x16xf32>
      %c0_15 = arith.constant 0 : index
      %c0_16 = arith.constant 0 : index
      %25 = vector.load %arg8[%c0_15, %c0_16] : memref<8x16xf32, #tpu.memory_space<vmem>>, vector<8x16xf32>
      tpu.vector_store %arg8[%c0_15, %c0_16], %24 {strides = array<i32>} : memref<8x16xf32, #tpu.memory_space<vmem>>, vector<8x16xf32>,
      %cst_17 = arith.constant 0.000000e+00 : f32
      %26 = vector.broadcast %cst_17 : f32 to vector<8x1xf32>
      %c0_18 = arith.constant 0 : index
      %c0_19 = arith.constant 0 : index
      %27 = vector.load %arg9[%c0_18, %c0_19] : memref<8x1xf32, #tpu.memory_space<vmem>>, vector<8x1xf32>
      tpu.vector_store %arg9[%c0_18, %c0_19], %26 {strides = array<i32>} : memref<8x1xf32, #tpu.memory_space<vmem>>, vector<8x1xf32>,
    } else {
    }
    %c0 = arith.constant 0 : index
    %c0_1 = arith.constant 0 : index
    %3 = vector.load %arg1[%c0, %c0_1] : memref<1x128xi32, #tpu.memory_space<vmem>>, vector<1x128xi32>
    %4 = tpu.iota {dimensions = array<i32: 0>} : vector<8x128xi32>
    %5 = vector.broadcast %3 : vector<1x128xi32> to vector<8x128xi32>
    %6 = arith.cmpi eq, %4, %5 : vector<8x128xi32>
    %7 = arith.extui %6 : vector<8x128xi1> to vector<8x128xi32>
    %8 = arith.sitofp %7 : vector<8x128xi32> to vector<8x128xf32>
    %c0_2 = arith.constant 0 : index
    %c0_3 = arith.constant 0 : index
    %9 = vector.load %arg8[%c0_2, %c0_3] : memref<8x16xf32, #tpu.memory_space<vmem>>, vector<8x16xf32>
    %c0_4 = arith.constant 0 : index
    %c0_5 = arith.constant 0 : index
    %10 = vector.load %arg2[%c0_4, %c0_5] : memref<128x16xf32, #tpu.memory_space<vmem>>, vector<128x16xf32>
    %cst = arith.constant dense<0.000000e+00> : vector<8x16xf32>
    %11 = tpu.matmul %8, %10, %cst {dimension_numbers = #tpu.dot_dimension_numbers<[1], [0], [0], [1], [0, 0, 1, 1], [], []>} : vector<8x128xf32>, vector<128x16xf32>, vector<8x16xf32> -> vector<8x16xf32>
    %12 = arith.addf %9, %11 : vector<8x16xf32>
    %c0_6 = arith.constant 0 : index
    %c0_7 = arith.constant 0 : index
    %13 = vector.load %arg8[%c0_6, %c0_7] : memref<8x16xf32, #tpu.memory_space<vmem>>, vector<8x16xf32>
    tpu.vector_store %arg8[%c0_6, %c0_7], %12 {strides = array<i32>} : memref<8x16xf32, #tpu.memory_space<vmem>>, vector<8x16xf32>,
    %c0_8 = arith.constant 0 : index
    %c0_9 = arith.constant 0 : index
    %14 = vector.load %arg9[%c0_8, %c0_9] : memref<8x1xf32, #tpu.memory_space<vmem>>, vector<8x1xf32>
    %15 = arith.extui %6 : vector<8x128xi1> to vector<8x128xi32>
    %16 = arith.sitofp %15 : vector<8x128xi32> to vector<8x128xf32>
    %cst_10 = arith.constant dense<0.000000e+00> : vector<8xf32>
    %17 = vector.multi_reduction <add>, %16, %cst_10 [1] : vector<8x128xf32> to vector<8xf32>
    %18 = vector.shape_cast %17 : vector<8xf32> to vector<8x1xf32>
    %19 = arith.addf %14, %18 : vector<8x1xf32>
    %c0_11 = arith.constant 0 : index
    %c0_12 = arith.constant 0 : index
    %20 = vector.load %arg9[%c0_11, %c0_12] : memref<8x1xf32, #tpu.memory_space<vmem>>, vector<8x1xf32>
    tpu.vector_store %arg9[%c0_11, %c0_12], %19 {strides = array<i32>} : memref<8x1xf32, #tpu.memory_space<vmem>>, vector<8x1xf32>,
    %c3_i32 = arith.constant 3 : i32
    %21 = arith.cmpi eq, %arg0, %c3_i32 : i32
    %22 = arith.extui %21 : i1 to i32
    %c0_i32_13 = arith.constant 0 : i32
    %23 = arith.cmpi ne, %22, %c0_i32_13 : i32
    scf.if %23 {
      %c0_14 = arith.constant 0 : index
      %c0_15 = arith.constant 0 : index
      %24 = vector.load %arg9[%c0_14, %c0_15] : memref<8x1xf32, #tpu.memory_space<vmem>>, vector<8x1xf32>
      %cst_16 = arith.constant 1.000000e+00 : f32
      %25 = vector.broadcast %cst_16 : f32 to vector<8x1xf32>
      %26 = arith.maximumf %24, %25 : vector<8x1xf32>
      %27 = tpu.reciprocal %26 {approx = true} : vector<8x1xf32> -> vector<8x1xf32>
      %c0_17 = arith.constant 0 : index
      %c0_18 = arith.constant 0 : index
      %28 = vector.load %arg8[%c0_17, %c0_18] : memref<8x16xf32, #tpu.memory_space<vmem>>, vector<8x16xf32>
      %29 = vector.broadcast %27 : vector<8x1xf32> to vector<8x16xf32>
      %30 = arith.mulf %28, %29 : vector<8x16xf32>
      %c0_19 = arith.constant 0 : index
      %c0_20 = arith.constant 0 : index
      %31 = vector.load %arg3[%c0_19, %c0_20] : memref<16x128xf32, #tpu.memory_space<vmem>>, vector<16x128xf32>
      %cst_21 = arith.constant dense<0.000000e+00> : vector<8x128xf32>
      %32 = tpu.matmul %30, %31, %cst_21 {dimension_numbers = #tpu.dot_dimension_numbers<[1], [0], [0], [1], [0, 0, 1, 1], [], []>} : vector<8x16xf32>, vector<16x128xf32>, vector<8x128xf32> -> vector<8x128xf32>
      %c0_22 = arith.constant 0 : index
      %c0_23 = arith.constant 0 : index
      %33 = vector.load %arg4[%c0_22, %c0_23] : memref<1x128xf32, #tpu.memory_space<vmem>>, vector<1x128xf32>
      %34 = vector.broadcast %33 : vector<1x128xf32> to vector<8x128xf32>
      %35 = arith.addf %32, %34 : vector<8x128xf32>
      %cst_24 = arith.constant 0.000000e+00 : f32
      %36 = vector.broadcast %cst_24 : f32 to vector<8x128xf32>
      %37 = arith.maximumf %35, %36 : vector<8x128xf32>
      %c0_25 = arith.constant 0 : index
      %c0_26 = arith.constant 0 : index
      %38 = vector.load %arg5[%c0_25, %c0_26] : memref<128x128xf32, #tpu.memory_space<vmem>>, vector<128x128xf32>
      %cst_27 = arith.constant dense<0.000000e+00> : vector<8x128xf32>
      %39 = tpu.matmul %37, %38, %cst_27 {dimension_numbers = #tpu.dot_dimension_numbers<[1], [0], [0], [1], [0, 0, 1, 1], [], []>} : vector<8x128xf32>, vector<128x128xf32>, vector<8x128xf32> -> vector<8x128xf32>
      %c0_28 = arith.constant 0 : index
      %c0_29 = arith.constant 0 : index
      %40 = vector.load %arg6[%c0_28, %c0_29] : memref<1x128xf32, #tpu.memory_space<vmem>>, vector<1x128xf32>
      %41 = vector.broadcast %40 : vector<1x128xf32> to vector<8x128xf32>
      %42 = arith.addf %39, %41 : vector<8x128xf32>
      %c0_30 = arith.constant 0 : index
      %c0_31 = arith.constant 0 : index
      %43 = vector.load %arg7[%c0_30, %c0_31] : memref<8x128xf32, #tpu.memory_space<vmem>>, vector<8x128xf32>
      tpu.vector_store %arg7[%c0_30, %c0_31], %42 {strides = array<i32>} : memref<8x128xf32, #tpu.memory_space<vmem>>, vector<8x128xf32>,
    } else {
    }
    return
  }
  func.func @transform_0(%arg0: i32) -> (i32, i32) {
    %c0_i32 = arith.constant 0 : i32
    %c0_i32_0 = arith.constant 0 : i32
    return %c0_i32, %arg0 : i32, i32
  }
  func.func @transform_1(%arg0: i32) -> (i32, i32) {
    %c0_i32 = arith.constant 0 : i32
    %c0_i32_0 = arith.constant 0 : i32
    return %arg0, %c0_i32 : i32, i32
  }
  func.func @transform_2(%arg0: i32) -> (i32, i32) {
    %c0_i32 = arith.constant 0 : i32
    %c0_i32_0 = arith.constant 0 : i32
    %c0_i32_1 = arith.constant 0 : i32
    return %c0_i32, %c0_i32_0 : i32, i32
  }
  func.func @transform_3(%arg0: i32) -> (i32, i32) {
    %c0_i32 = arith.constant 0 : i32
    %c0_i32_0 = arith.constant 0 : i32
    %c0_i32_1 = arith.constant 0 : i32
    return %c0_i32, %c0_i32_0 : i32, i32
  }
  func.func @transform_4(%arg0: i32) -> (i32, i32) {
    %c0_i32 = arith.constant 0 : i32
    %c0_i32_0 = arith.constant 0 : i32
    %c0_i32_1 = arith.constant 0 : i32
    return %c0_i32, %c0_i32_0 : i32, i32
  }
  func.func @transform_5(%arg0: i32) -> (i32, i32) {
    %c0_i32 = arith.constant 0 : i32
    %c0_i32_0 = arith.constant 0 : i32
    %c0_i32_1 = arith.constant 0 : i32
    return %c0_i32, %c0_i32_0 : i32, i32
  }
  func.func @transform_6(%arg0: i32) -> (i32, i32) {
    %c0_i32 = arith.constant 0 : i32
    %c0_i32_0 = arith.constant 0 : i32
    %c0_i32_1 = arith.constant 0 : i32
    return %c0_i32, %c0_i32_0 : i32, i32
  }
}

</mosaic_0001>

<bundles_post_ra>
// kernel: tpu_custom_call.1
= control target key start
LH: loop header
LB: loop body
LE: loop exit
PB: predicated region body
PF: predicated region fallthrough
CT: control target
= control target key end

     0   :  { %11 = vsyncpa [#allocation5], 0  ;;  %s907_s21 = smov 0   ;;  %s1039_s0 = inlined_call_operand.vmem [shape: s32[1,512], index: 0, kind: input, shape index: {}]   ;;  %s1040_s1 = inlined_call_operand.vmem [shape: f32[512,16], index: 1, kind: input, shape index: {}]   ;;  %s1041_s2 = inlined_call_operand.vmem [shape: f32[16,128], index: 2, kind: input, shape index: {}]   ;;  %s1042_s3 = inlined_call_operand.vmem [shape: f32[1,128], index: 3, kind: input, shape index: {}]   ;;  %s1043_s4 = inlined_call_operand.vmem [shape: f32[128,128], index: 4, kind: input, shape index: {}]   ;;  %s1044_s5 = inlined_call_operand.vmem [shape: f32[1,128], index: 5, kind: input, shape index: {}]   ;;  %s1045_s6 = inlined_call_operand.hbm [shape: f32[8,128], index: 6, kind: output, shape index: {}]  }
   0x1 LB: > { %s913_s22 = sadd.s32 4294967295, %s860_s21   ;;  %p617_p0 = scmp.ge.s32.totalorder %s860_s21, 1  ;;  %s860_s21 = sphi %s907_s21, %s17_s21  }
   0x2   : > { %p217_p1 = scmp.lt.s32.totalorder %s860_s21, 5 }
   0x4   : > { %p218_p2 = pnand %p617_p0, %p217_p1 }
   0x5   : > { %p245_p3 = scmp.lt.s32.totalorder (!%p218_p2), %s913_s22, 3  ;;  %s618_s23 = sshll.u32 (!%p218_p2), %s913_s22, 4 }
   0x6   : > { %221 = sbr.rel (%p218_p2) target bundleno = 778 (0x30a), region = 44  ;;  %p249_p4 = scmp.lt.s32.totalorder (!%p218_p2), %s618_s23, 63 }
   0x7   : > { %p620_p5 = scmp.ne.s32.totalorder (!%p218_p2), %s913_s22, 0 }
   0xd   : > { %s920_s24 = scalar_select %p245_p3, %s913_s22, 3 }
   0xe   : > { %s1047_s23 = smov (!%p249_p4, %s618_s23), 63  ;;  %257 = sbr.rel (%p620_p5) target bundleno = 21 (0x15), region = 48 }
   0xf   : > { %s247_s27 = scalar_lea.vmem %s1039_s0, %s920_s24  ;;  %s619_s28 = sshll.u32 %s1047_s23, 3  ;;  %vm258_vm0 = vcmask (!%p620_p5), 130048   ;;  %vm260_vm1 = vcmask (!%p620_p5), 7168   ;;  %v862_v0 = vmov (!%p620_p5), 0.0  }
  0x10   : > { %s929_s7 = scalar_lea.vmem %s1040_s1, %s619_s28  ;;  %259 = vst.msk [vmem:[#allocation2] sm:$0xff] (!%p620_p5), %vm258_vm0, %v862_v0 }
  0x11   : > { %261 = vst.msk [vmem:[#allocation3] sm:$0xff] (!%p620_p5), %vm260_vm1, %v862_v0 }
  0x15 PF: > { %v273_v1 = vld [vmem:[%s929_s7] sm:$0xff]  ;;  %v274_v2 = vld [vmem:[%s929_s7 + $0x8] sm:$0xff]  ;;  %v275_v3 = vld [vmem:[%s929_s7 + $0x10] sm:$0xff]  ;;  %v263_v4 = vlaneseq  ;;  %v863_v5 = vmov 0.0|0.0   ;;  %vm864_vm2 = vmmov 0   ;;  %v865_v8 = vmov 0.0  }
  0x16   : > { %746 = vmatprep.subr.bf16.mxu0 %v863_v5  ;;  %v747_v6 = vpack.c.bf16 %v274_v2, %v273_v1  ;;  %v276_v7 = vld [vmem:[%s929_s7 + $0x18] sm:$0xff]  ;;  %701 = vmatprep.mubr.msk.f32.mxu0 %vm864_vm2, %v865_v8  ;;  %v277_v11 = vld [vmem:[%s929_s7 + $0x20] sm:$0xff]  ;;  %v278_v12 = vld [vmem:[%s929_s7 + $0x28] sm:$0xff]  ;;  %v866_v31 = vmov 1.0   ;;  %vm366_vm4 = vcmask 7168   ;;  %vm360_vm5 = vcmask 130048  }
  0x17   : > { %v264_v9 = vshrl.u32 %v263_v4, 7  ;;  %v750_v10 = vpack.c.bf16 %v276_v7, %v275_v3  ;;  %v621_v13 = vld [vmem:[%s247_s27] ss:$0 sm:$0xff]  ;;  %v753_v14 = vpack.c.bf16 %v278_v12, %v277_v11  ;;  %v279_v16 = vld [vmem:[%s929_s7 + $0x30] sm:$0xff]  ;;  %v280_v17 = vld [vmem:[%s929_s7 + $0x38] sm:$0xff]  ;;  %p624_p6 = scmp.ne.s32.totalorder %s913_s22, 3 }
  0x18   : > { %748 = vmatpush3.bf16.msra.mxu0 %v747_v6  ;;  %v756_v18 = vpack.c.bf16 %v280_v17, %v279_v16  ;;  %v281_v19 = vld [vmem:[%s929_s7 + $0x40] sm:$0xff]  ;;  %v282_v20 = vld [vmem:[%s929_s7 + $0x48] sm:$0xff]  ;;  %v283_v22 = vld [vmem:[%s929_s7 + $0x50] sm:$0xff]  ;;  %v867_v42 = vmov (!%p624_p6), 0   ;;  %v868_v44 = vmov (!%p624_p6), 0.0|0.0   ;;  %vm869_vm6 = vmmov (!%p624_p6), 0  }
  0x19   : > { %749 = vmatprep.subr.bf16.mxu0 %v863_v5  ;;  %vm269_vm3 = vcmp.eq.s32.totalorder %v264_v9, %v621_v13  ;;  %v759_v21 = vpack.c.bf16 %v282_v20, %v281_v19  ;;  %v284_v23 = vld [vmem:[%s929_s7 + $0x58] sm:$0xff]  ;;  %v285_v25 = vld [vmem:[%s929_s7 + $0x60] sm:$0xff]  ;;  %v286_v26 = vld [vmem:[%s929_s7 + $0x68] sm:$0xff]  ;;  %821 = vset.pattern.permute.xlu0 (!%p624_p6), %v867_v42  ;;  %v870_v47 = vmov (!%p624_p6), 0.0  }
  0x1a   : > { %v622_v15 = vsel %vm269_vm3, 1.0, %v865_v8  ;;  %v762_v24 = vpack.c.bf16 %v284_v23, %v283_v22  ;;  %v765_v27 = vpack.c.bf16 %v286_v26, %v285_v25  ;;  %v287_v28 = vld [vmem:[%s929_s7 + $0x70] sm:$0xff]  ;;  %v288_v29 = vld [vmem:[%s929_s7 + $0x78] sm:$0xff]  ;;  %v362_v32 = vld [vmem:[#allocation3] sm:$0xff]  ;;  %773 = vmatprep.subr.bf16.mxu1 (!%p624_p6), %v868_v44  ;;  %743 = vmatprep.mubr.msk.f32.mxu1 (!%p624_p6), %vm869_vm6, %v870_v47 }
  0x1b   : > { %363 = vadd.xlane.f32.xlu0 %v622_v15  ;;  %v768_v30 = vpack.c.bf16 %v288_v29, %v287_v28  ;;  %v272_v35 = vld [vmem:[#allocation2] sm:$0xff]  ;;  %v383_v41 = vld [vmem:[%s1041_s2 + $0x8] sm:$0xff] (!%p624_p6)  ;;  %v467_v50 = vld [vmem:[%s1043_s4 + $0x10] sm:$0xff] (!%p624_p6) }
  0x1c   : > { %751 = vmatpush3.bf16.msra.mxu0 %v750_v10  ;;  %v382_v40 = vld [vmem:[%s1041_s2] sm:$0xff] (!%p624_p6)  ;;  %v466_v49 = vld [vmem:[%s1043_s4 + $0x8] sm:$0xff] (!%p624_p6)  ;;  %v468_v52 = vld [vmem:[%s1043_s4 + $0x18] sm:$0xff] (!%p624_p6) }
  0x1d   : > { %752 = vmatprep.subr.bf16.mxu0 %v863_v5  ;;  %v771_v45 = vpack.c.bf16 (!%p624_p6), %v383_v41, %v382_v40  ;;  %v465_v48 = vld [vmem:[%s1043_s4] sm:$0xff] (!%p624_p6)  ;;  %v777_v53 = vpack.c.bf16 (!%p624_p6), %v468_v52, %v467_v50  ;;  %v470_v55 = vld [vmem:[%s1043_s4 + $0x28] sm:$0xff] (!%p624_p6)  ;;  %v471_v57 = vld [vmem:[%s1043_s4 + $0x30] sm:$0xff] (!%p624_p6) }
  0x1e   : > { %v774_v51 = vpack.c.bf16 (!%p624_p6), %v466_v49, %v465_v48  ;;  %v469_v54 = vld [vmem:[%s1043_s4 + $0x20] sm:$0xff] (!%p624_p6)  ;;  %v472_v58 = vld [vmem:[%s1043_s4 + $0x38] sm:$0xff] (!%p624_p6)  ;;  %v474_v61 = vld [vmem:[%s1043_s4 + $0x48] sm:$0xff] (!%p624_p6) }
  0x1f   : > { %v780_v56 = vpack.c.bf16 (!%p624_p6), %v470_v55, %v469_v54  ;;  %v783_v59 = vpack.c.bf16 (!%p624_p6), %v472_v58, %v471_v57  ;;  %v473_v60 = vld [vmem:[%s1043_s4 + $0x40] sm:$0xff] (!%p624_p6)  ;;  %v475_v63 = vld [vmem:[%s1043_s4 + $0x50] sm:$0xff] (!%p624_p6)  ;;  %v476_v0 = vld [vmem:[%s1043_s4 + $0x58] sm:$0xff] (!%p624_p6) }
  0x20   : > { %754 = vmatpush3.bf16.msra.mxu0 %v753_v14  ;;  %775 = vmatpush3.bf16.msra.mxu1 (!%p624_p6), %v774_v51  ;;  %v786_v62 = vpack.c.bf16 (!%p624_p6), %v474_v61, %v473_v60  ;;  %v789_v1 = vpack.c.bf16 (!%p624_p6), %v476_v0, %v475_v63  ;;  %v477_v2 = vld [vmem:[%s1043_s4 + $0x60] sm:$0xff] (!%p624_p6)  ;;  %v478_v3 = vld [vmem:[%s1043_s4 + $0x68] sm:$0xff] (!%p624_p6)  ;;  %v479_v8 = vld [vmem:[%s1043_s4 + $0x70] sm:$0xff] (!%p624_p6) }
  0x21   : > { %755 = vmatprep.subr.bf16.mxu0 %v863_v5  ;;  %776 = vmatprep.subr.bf16.mxu1 (!%p624_p6), %v868_v44  ;;  %v792_v4 = vpack.c.bf16 (!%p624_p6), %v478_v3, %v477_v2  ;;  %v480_v9 = vld [vmem:[%s1043_s4 + $0x78] sm:$0xff] (!%p624_p6)  ;;  %v625_v11 = vld [vmem:[%s1042_s3] ss:$0 sm:$0xff] (!%p624_p6) }
  0x22   : > { %v795_v10 = vpack.c.bf16 (!%p624_p6), %v480_v9, %v479_v8  ;;  %v627_v16 = vld [vmem:[%s1044_s5] ss:$0 sm:$0xff] (!%p624_p6) }
  0x24   : > { %757 = vmatpush3.bf16.msra.mxu0 %v756_v18  ;;  %778 = vmatpush3.bf16.msra.mxu1 (!%p624_p6), %v777_v53 }
  0x25   : > { %758 = vmatprep.subr.bf16.mxu0 %v863_v5  ;;  %779 = vmatprep.subr.bf16.mxu1 (!%p624_p6), %v868_v44 }
  0x28   : > { %760 = vmatpush3.bf16.msra.mxu0 %v759_v21  ;;  %781 = vmatpush3.bf16.msra.mxu1 (!%p624_p6), %v780_v56 }
  0x29   : > { %761 = vmatprep.subr.bf16.mxu0 %v863_v5  ;;  %782 = vmatprep.subr.bf16.mxu1 (!%p624_p6), %v868_v44 }
  0x2c   : > { %763 = vmatpush3.bf16.msra.mxu0 %v762_v24  ;;  %784 = vmatpush3.bf16.msra.mxu1 (!%p624_p6), %v783_v59 }
  0x2d   : > { %764 = vmatprep.subr.bf16.mxu0 %v863_v5  ;;  %785 = vmatprep.subr.bf16.mxu1 (!%p624_p6), %v868_v44 }
  0x30   : > { %766 = vmatpush3.bf16.msra.mxu0 %v765_v27  ;;  %787 = vmatpush3.bf16.msra.mxu1 (!%p624_p6), %v786_v62 }
  0x31   : > { %767 = vmatprep.subr.bf16.mxu0 %v863_v5  ;;  %788 = vmatprep.subr.bf16.mxu1 (!%p624_p6), %v868_v44 }
  0x34   : > { %769 = vmatpush3.bf16.msra.mxu0 %v768_v30  ;;  %790 = vmatpush3.bf16.msra.mxu1 (!%p624_p6), %v789_v1 }
  0x35   : > { %770 = vmatprep.subr.bf16.mxu0 (!%p624_p6), %v868_v44  ;;  %791 = vmatprep.subr.bf16.mxu1 (!%p624_p6), %v868_v44 }
  0x37   : > { %702 = vmatmul.mubr.msk.f32.vlgmr.msra.gmra.mrb[0].mxu0 %vm269_vm3, %v866_v31 }
  0x38   : > { %772 = vmatpush3.bf16.msra.mxu0 (!%p624_p6), %v771_v45  ;;  %708 = vmatprep.mubr.msk.f32.mxu0 (!%p624_p6), %vm869_vm6, %v870_v47 }
  0x39   : > { %793 = vmatpush3.bf16.msra.mxu1 (!%p624_p6), %v792_v4 }
  0x3a   : > { %794 = vmatprep.subr.bf16.mxu1 (!%p624_p6), %v868_v44 }
  0x3d   : > { %796 = vmatpush3.bf16.msra.mxu1 (!%p624_p6), %v795_v10 }
  0xa8   : > { %v364_v33 = vpop.xlane.xlu0 %363 }
  0xa9   : > { %v365_v34 = vadd.f32 %v364_v33, %v362_v32 }
  0xab   : > { %367 = vst.msk [vmem:[#allocation3] sm:$0xff] %vm366_vm4, %v365_v34 }
  0xb2   : > { %v372_v39 = vld [vmem:[#allocation3] sm:$0xff] (!%p624_p6) }
  0xb3   : > { %v373_v43 = vmax.f32 (!%p624_p6), %v372_v39, 1.0 }
  0xb5   : > { %822 = vrcp.f32 (!%p624_p6), %v373_v43 }
  0xbf   : > { %v823_v46 = vpop.eup (!%p624_p6), %822 }
  0xc0   : > { %378 = vperm.xlu0 (!%p624_p6), %821, %v823_v46  }
 0x107   : > { %371 = sbr.rel (%p624_p6) target bundleno = 753 (0x2f1), region = 52 }
 0x10a   : > { %v355_v36 = vpop.f32.mrb[0].mxu0 }
 0x10b   : > { %v359_v37 = vadd.f32 %v355_v36, %v272_v35  ;;  %v703_v38 = vpop.f32.mrb[1].mxu0 }
 0x10d   : > { %361 = vst.msk [vmem:[#allocation2] sm:$0xff] %vm360_vm5, %v359_v37 }
 0x114   : > { %v375_v5 = vld [vmem:[#allocation2] sm:$0xff] }
 0x13f   : > { %v379_v6 = vpop.permute.xlu0 %378 }
 0x140   : > { %v381_v7 = vmul.f32 %v379_v6, %v375_v5 }
 0x142   : > { %709 = vmatmul.mubr.msk.f32.vlgmr.msra.gmra.mrb[0].mxu0 %vm360_vm5, %v381_v7 }
 0x215   : > { %v460_v12 = vpop.f32.mrb[0].mxu0 }
 0x216   : > { %v461_v13 = vadd.f32 %v625_v11, %v460_v12  ;;  %v710_v14 = vpop.f32.mrb[1].mxu0 }
 0x218   : > { %v464_v15 = vmax.f32 %v461_v13, 0.0 }
 0x21a   : > { %744 = vmatmul.mubr.f32.vlgmr.msra.gmra.mrb[0].mxu1 %v464_v15 }
 0x2ed   : > { %v554_v17 = vpop.f32.mrb[0].mxu1 }
 0x2ee   : > { %v555_v18 = vadd.f32 %v627_v16, %v554_v17  ;;  %v745_v19 = vpop.f32.mrb[1].mxu1 }
 0x2f0   : > { %558 = vst [vmem:[#allocation4] sm:$0xff] %v555_v18 }
 0x2f1 PF: > { %p801_p7 = scmp.eq.s32.totalorder %s913_s22, 3  ;;  %s871_s28 = smov [#allocation4]  }
 0x2f2   : > { %s566_s29 = sshll.u32 %s871_s28, 4  ;;  %s567_s29 = int_to_ptr.vmem [resolvable:$true] %s566_s29 }
 0x2f3   : > { %s824_s30 = scalar_lea.vmem %s567_s29, 128  ;;  %p831_p11 = scmp.lt.s32.totalorder %s567_s29, %s567_s29 }
 0x2f4   : > { %p825_p8 = scmp.ne.s32.totalorder %s567_s29, %s824_s30  ;;  %p832_p12 = scmp.lt.s32.totalorder %s824_s30, %s824_s30 }
 0x2f6   : > { %p826_p9 = pnand %p825_p8, %p801_p7  ;;  %p833_p13 = por %p832_p12, %p831_p11 }
 0x2f8   : > { %p827_p10 = pneg %p826_p9 }
 0x2fa   : > { %p834_p0 = pnand %p833_p13, %p827_p10 }
 0x2fc   : > { %837 = shalt.err (!%p834_p0)
}
 0x2fd   : > { %s838_s9 = scalar_lea.hbm %s1045_s6, 128 }
 0x2fe   : > { %p839_p1 = scmp.ne.s32.totalorder %s1045_s6, %s838_s9  ;;  %p844_p4 = scmp.lt.u32.totalorder %s838_s9, %s1045_s6 }
 0x300   : > { %p840_p2 = pnand %p839_p1, %p801_p7 }
 0x302   : > { %p841_p3 = pneg %p840_p2 }
 0x304   : > { %p846_p5 = pnand %p844_p4, %p841_p3 }
 0x306   : > { %849 = shalt.err (!%p846_p5)
}
 0x307   : > { %798 = dma.vmem_to_hbm [thread:$0]  (%p801_p7), %s567_s29, 128, %s1045_s6, [#allocation5]  }
 0x308   : > { %855 = dma.done.wait (%p801_p7), [#allocation5], 128  }
 0x309   : > { %857 = vsyncadd (%p801_p7), [#allocation5], 4294967168 }
 0x30a PF: > { %s17_s21 = sadd.s32 1, %s860_s21  }
 0x30b   : > { %p14_p6 = scmp.ge.s32.totalorder %s17_s21, 6  }
 0x30d   :  { %16 = sbr.rel (!%p14_p6) target bundleno = 1 (0x1), region = 82 }
 0x314   :  { %579 = vsyncpa [#allocation5], 1 }
 0x315   :  { %581 = vsyncpa [#allocation5 + $0x1], 1 }

</bundles_post_ra>
